<compile_context>
chip_gen: v7x
topology: tpu7x:2x2x1
jax: 0.10.0
libtpu: 0.0.40
codegen_flags: <defaults>
</compile_context>

<pallas_src>
import functools

import numpy as np

import jax
import jax.numpy as jnp
from jax.experimental import pallas as pl
from jax.experimental.pallas import tpu as pltpu


def _round_up(x, m):
    return (x + m - 1) // m * m


def _fused_mlp_kernel(*refs, num_layers):
    """refs = (x_ref, w0, b0, w1, b1, ..., o_ref). Whole MLP in one body."""
    x_ref = refs[0]
    o_ref = refs[-1]
    h = x_ref[...]  # (tm, d_in) in the matmul compute dtype
    for l in range(num_layers):
        w = refs[1 + 2 * l][...]          # (d_in, d_out), VMEM-resident across grid
        b = refs[2 + 2 * l][...]          # (1, d_out), fp32
        # MXU matmul in the weight dtype (bf16 fast path or fp32), fp32 accumulate.
        y = jnp.dot(h.astype(w.dtype), w, preferred_element_type=jnp.float32)
        y = y + b                          # fp32 bias add on the VPU
        if l < num_layers - 1:
            y = jnp.maximum(y, 0.0)        # fused ReLU, stays in vregs
        h = y
    # Single cast-on-store epilogue.
    o_ref[...] = h.astype(o_ref.dtype)


def prepare_params(params, compute_dtype=jnp.bfloat16):
    """One-time weight/bias preparation (cast + bias reshape). Cache the result
    and reuse it across forward calls — no per-call padding/cast passes.

    `params` is a list of (w, b) with w shaped (in_features, out_features)
    (i.e. torch nn.Linear's weight transposed) and b shaped (out_features,).
    """
    prepared = []
    for w, b in params:
        w_c = jnp.asarray(w, dtype=compute_dtype)
        b_c = jnp.asarray(b, dtype=jnp.float32).reshape(1, -1)
        prepared.append((w_c, b_c))
    return prepared


def basic_linear_network_forward(x, prepared_params, *, out_dtype=None):
    """Fused forward: Linear -> ReLU -> ... -> Linear -> Identity
    (BasicLinearNetwork with activation='ReLU', output_activation='Identity',
     batchnorm=False)."""
    batch, input_dim = x.shape
    num_layers = len(prepared_params)
    compute_dtype = prepared_params[0][0].dtype
    out_dim = prepared_params[-1][0].shape[1]
    if out_dtype is None:
        out_dtype = x.dtype

    # ---- batch tile selection ----
    itemsize = np.dtype(compute_dtype).itemsize
    sub_mult = 8 * (4 // itemsize)             # 8 for f32, 16 for bf16, 32 for int8
    b_min = _round_up(batch, sub_mult)
    if b_min >= 2 * sub_mult:
        # Aim for >= 2 grid steps (v7x megacore), tiles up to 512 rows.
        tm = min(512, _round_up(pl.cdiv(b_min, 2), sub_mult))
    else:
        tm = b_min
    b_pad = _round_up(batch, tm)
    grid = (b_pad // tm,)

    # ---- input prep: cast once; pad batch rows only if needed ----
    x_c = x.astype(compute_dtype)
    if b_pad != batch:
        x_c = jnp.zeros((b_pad, input_dim), compute_dtype).at[:batch, :].set(x_c)

    # ---- specs ----
    flat_inputs = [x_c]
    in_specs = [pl.BlockSpec((tm, input_dim), lambda i: (i, 0))]
    for w, b in prepared_params:
        flat_inputs += [w, b]
        # Same block for every grid step -> weights/biases stay resident in VMEM.
        in_specs.append(pl.BlockSpec(w.shape, lambda i: (0, 0)))
        in_specs.append(pl.BlockSpec(b.shape, lambda i: (0, 0)))

    # ---- cost estimate & VMEM budget ----
    dims = [input_dim] + [w.shape[1] for (w, _) in prepared_params]
    flops = 2 * batch * sum(a * b for a, b in zip(dims[:-1], dims[1:]))
    param_bytes = sum(
        w.size * w.dtype.itemsize + b.size * b.dtype.itemsize
        for (w, b) in prepared_params
    )
    out_itemsize = np.dtype(out_dtype).itemsize
    bytes_accessed = (
        b_pad * input_dim * itemsize + param_bytes + b_pad * out_dim * out_itemsize
    )
    cost = pl.CostEstimate(flops=flops, transcendentals=0,
                           bytes_accessed=bytes_accessed)

    # Double-buffered x/out tiles + (conservatively double-buffered) params.
    tile_bytes = tm * input_dim * itemsize + tm * out_dim * out_itemsize
    needed = 2 * (param_bytes + tile_bytes)
    # Headroomed, capped below v7x's 64 MiB physical VMEM (safe on v5e/v6e too).
    vmem_limit = int(min(max(2 * needed + (4 << 20), 32 << 20), 56 << 20))

    kernel = functools.partial(_fused_mlp_kernel, num_layers=num_layers)

    y = pl.pallas_call(
        kernel,
        out_shape=jax.ShapeDtypeStruct((b_pad, out_dim), out_dtype),
        grid=grid,
        in_specs=in_specs,
        out_specs=pl.BlockSpec((tm, out_dim), lambda i: (i, 0)),
        compiler_params=pltpu.CompilerParams(
            dimension_semantics=("parallel",),
            vmem_limit_bytes=vmem_limit,
        ),
        cost_estimate=cost,
    )(*flat_inputs)

    if b_pad != batch:
        y = y[:batch]
    return y


def init_basic_linear_network(key, input_dim, hidden_layers):
    """Deterministic init mimicking torch.nn.Linear default
    (uniform in +/-1/sqrt(fan_in)). Weights stored as (in, out)."""
    dims = [input_dim] + list(hidden_layers)
    params = []
    for fan_in, fan_out in zip(dims[:-1], dims[1:]):
        key, kw, kb = jax.random.split(key, 3)
        bound = 1.0 / jnp.sqrt(fan_in)
        w = jax.random.uniform(kw, (fan_in, fan_out), jnp.float32, -bound, bound)
        b = jax.random.uniform(kb, (fan_out,), jnp.float32, -bound, bound)
        params.append((w, b))
    return params


def reference_forward(x, params, compute_dtype=jnp.float32):
    n = len(params)
    h = x
    for i, (w, b) in enumerate(params):
        y = jnp.dot(
            h.astype(compute_dtype),
            w.astype(compute_dtype),
            preferred_element_type=jnp.float32,
        ) + b.astype(jnp.float32)
        if i != n - 1:
            y = jnp.maximum(y, 0.0)
        h = y
    return h


if __name__ == "__main__":
    key = jax.random.PRNGKey(0)
    k_in, k_params = jax.random.split(key)

    batch = 8
    input_dim = 16
    hidden_layers = [32, 32, 8]  # MLP: 16 -> 32 -> 32 -> 8

    x = jax.random.normal(k_in, (batch, input_dim), dtype=jnp.float32)
    params = init_basic_linear_network(k_params, input_dim, hidden_layers)

    # --- fp32 path: exact vs fp32 reference (matches PyTorch fp32 semantics) ---
    p_f32 = prepare_params(params, compute_dtype=jnp.float32)
    out = jax.block_until_ready(basic_linear_network_forward(x, p_f32))
    ref = reference_forward(x, params, jnp.float32)
    assert out.shape == (batch, hidden_layers[-1])
    assert jnp.allclose(out, ref, atol=1e-5, rtol=1e-5), "fp32 mismatch vs reference"

    # --- bf16 MXU fast path (default; fp32 accumulation): vs bf16 reference ---
    p_bf16 = prepare_params(params)  # bf16 default
    out_bf16 = jax.block_until_ready(basic_linear_network_forward(x, p_bf16))
    ref_bf16 = reference_forward(x, params, jnp.bfloat16)
    assert out_bf16.shape == (batch, hidden_layers[-1])
    assert jnp.allclose(out_bf16, ref_bf16, atol=1e-2, rtol=1e-2), "bf16 mismatch"

    print("KERNEL_OK")
</pallas_src>

<mosaic_0001>
module attributes {stable_mosaic.version = 11 : i64} {
  func.func @_fused_mlp_kernel(%arg0: i32, %arg1: memref<8x16xf32, #tpu.memory_space<vmem>>, %arg2: memref<16x32xf32, #tpu.memory_space<vmem>>, %arg3: memref<1x32xf32, #tpu.memory_space<vmem>>, %arg4: memref<32x32xf32, #tpu.memory_space<vmem>>, %arg5: memref<1x32xf32, #tpu.memory_space<vmem>>, %arg6: memref<32x8xf32, #tpu.memory_space<vmem>>, %arg7: memref<1x8xf32, #tpu.memory_space<vmem>>, %arg8: memref<8x8xf32, #tpu.memory_space<vmem>>) attributes {dimension_semantics = [#tpu.dimension_semantics<parallel>], iteration_bounds = array<i64: 1>, scalar_prefetch = 0 : i64, scratch_operands = 0 : i64, tpu.core_type = #tpu.core_type<tc>, window_params = [{transform_indices = @transform_0, window_bounds = array<i64: 8, 16>}, {pipeline_mode = #tpu.pipeline_mode<synchronous>, transform_indices = @transform_1, window_bounds = array<i64: 16, 32>}, {pipeline_mode = #tpu.pipeline_mode<synchronous>, transform_indices = @transform_2, window_bounds = array<i64: 1, 32>}, {pipeline_mode = #tpu.pipeline_mode<synchronous>, transform_indices = @transform_3, window_bounds = array<i64: 32, 32>}, {pipeline_mode = #tpu.pipeline_mode<synchronous>, transform_indices = @transform_4, window_bounds = array<i64: 1, 32>}, {pipeline_mode = #tpu.pipeline_mode<synchronous>, transform_indices = @transform_5, window_bounds = array<i64: 32, 8>}, {pipeline_mode = #tpu.pipeline_mode<synchronous>, transform_indices = @transform_6, window_bounds = array<i64: 1, 8>}, {transform_indices = @transform_7, window_bounds = array<i64: 8, 8>}]} {
    %c0 = arith.constant 0 : index
    %c0_0 = arith.constant 0 : index
    %0 = vector.load %arg1[%c0, %c0_0] : memref<8x16xf32, #tpu.memory_space<vmem>>, vector<8x16xf32>
    %c0_1 = arith.constant 0 : index
    %c0_2 = arith.constant 0 : index
    %1 = vector.load %arg2[%c0_1, %c0_2] : memref<16x32xf32, #tpu.memory_space<vmem>>, vector<16x32xf32>
    %c0_3 = arith.constant 0 : index
    %c0_4 = arith.constant 0 : index
    %2 = vector.load %arg3[%c0_3, %c0_4] : memref<1x32xf32, #tpu.memory_space<vmem>>, vector<1x32xf32>
    %cst = arith.constant dense<0.000000e+00> : vector<8x32xf32>
    %3 = tpu.matmul %0, %1, %cst {dimension_numbers = #tpu.dot_dimension_numbers<[1], [0], [0], [1], [0, 0, 1, 1], [], []>} : vector<8x16xf32>, vector<16x32xf32>, vector<8x32xf32> -> vector<8x32xf32>
    %4 = vector.broadcast %2 : vector<1x32xf32> to vector<8x32xf32>
    %5 = arith.addf %3, %4 : vector<8x32xf32>
    %cst_5 = arith.constant 0.000000e+00 : f32
    %6 = vector.broadcast %cst_5 : f32 to vector<8x32xf32>
    %7 = arith.maximumf %5, %6 : vector<8x32xf32>
    %c0_6 = arith.constant 0 : index
    %c0_7 = arith.constant 0 : index
    %8 = vector.load %arg4[%c0_6, %c0_7] : memref<32x32xf32, #tpu.memory_space<vmem>>, vector<32x32xf32>
    %c0_8 = arith.constant 0 : index
    %c0_9 = arith.constant 0 : index
    %9 = vector.load %arg5[%c0_8, %c0_9] : memref<1x32xf32, #tpu.memory_space<vmem>>, vector<1x32xf32>
    %cst_10 = arith.constant dense<0.000000e+00> : vector<8x32xf32>
    %10 = tpu.matmul %7, %8, %cst_10 {dimension_numbers = #tpu.dot_dimension_numbers<[1], [0], [0], [1], [0, 0, 1, 1], [], []>} : vector<8x32xf32>, vector<32x32xf32>, vector<8x32xf32> -> vector<8x32xf32>
    %11 = vector.broadcast %9 : vector<1x32xf32> to vector<8x32xf32>
    %12 = arith.addf %10, %11 : vector<8x32xf32>
    %cst_11 = arith.constant 0.000000e+00 : f32
    %13 = vector.broadcast %cst_11 : f32 to vector<8x32xf32>
    %14 = arith.maximumf %12, %13 : vector<8x32xf32>
    %c0_12 = arith.constant 0 : index
    %c0_13 = arith.constant 0 : index
    %15 = vector.load %arg6[%c0_12, %c0_13] : memref<32x8xf32, #tpu.memory_space<vmem>>, vector<32x8xf32>
    %c0_14 = arith.constant 0 : index
    %c0_15 = arith.constant 0 : index
    %16 = vector.load %arg7[%c0_14, %c0_15] : memref<1x8xf32, #tpu.memory_space<vmem>>, vector<1x8xf32>
    %cst_16 = arith.constant dense<0.000000e+00> : vector<8x8xf32>
    %17 = tpu.matmul %14, %15, %cst_16 {dimension_numbers = #tpu.dot_dimension_numbers<[1], [0], [0], [1], [0, 0, 1, 1], [], []>} : vector<8x32xf32>, vector<32x8xf32>, vector<8x8xf32> -> vector<8x8xf32>
    %18 = vector.broadcast %16 : vector<1x8xf32> to vector<8x8xf32>
    %19 = arith.addf %17, %18 : vector<8x8xf32>
    %c0_17 = arith.constant 0 : index
    %c0_18 = arith.constant 0 : index
    %20 = vector.load %arg8[%c0_17, %c0_18] : memref<8x8xf32, #tpu.memory_space<vmem>>, vector<8x8xf32>
    tpu.vector_store %arg8[%c0_17, %c0_18], %19 {strides = array<i32>} : memref<8x8xf32, #tpu.memory_space<vmem>>, vector<8x8xf32>,
    return
  }
  func.func @transform_0(%arg0: i32) -> (i32, i32) {
    %c0_i32 = arith.constant 0 : i32
    %c0_i32_0 = arith.constant 0 : i32
    return %arg0, %c0_i32 : i32, i32
  }
  func.func @transform_1(%arg0: i32) -> (i32, i32) {
    %c0_i32 = arith.constant 0 : i32
    %c0_i32_0 = arith.constant 0 : i32
    %c0_i32_1 = arith.constant 0 : i32
    return %c0_i32, %c0_i32_0 : i32, i32
  }
  func.func @transform_2(%arg0: i32) -> (i32, i32) {
    %c0_i32 = arith.constant 0 : i32
    %c0_i32_0 = arith.constant 0 : i32
    %c0_i32_1 = arith.constant 0 : i32
    return %c0_i32, %c0_i32_0 : i32, i32
  }
  func.func @transform_3(%arg0: i32) -> (i32, i32) {
    %c0_i32 = arith.constant 0 : i32
    %c0_i32_0 = arith.constant 0 : i32
    %c0_i32_1 = arith.constant 0 : i32
    return %c0_i32, %c0_i32_0 : i32, i32
  }
  func.func @transform_4(%arg0: i32) -> (i32, i32) {
    %c0_i32 = arith.constant 0 : i32
    %c0_i32_0 = arith.constant 0 : i32
    %c0_i32_1 = arith.constant 0 : i32
    return %c0_i32, %c0_i32_0 : i32, i32
  }
  func.func @transform_5(%arg0: i32) -> (i32, i32) {
    %c0_i32 = arith.constant 0 : i32
    %c0_i32_0 = arith.constant 0 : i32
    %c0_i32_1 = arith.constant 0 : i32
    return %c0_i32, %c0_i32_0 : i32, i32
  }
  func.func @transform_6(%arg0: i32) -> (i32, i32) {
    %c0_i32 = arith.constant 0 : i32
    %c0_i32_0 = arith.constant 0 : i32
    %c0_i32_1 = arith.constant 0 : i32
    return %c0_i32, %c0_i32_0 : i32, i32
  }
  func.func @transform_7(%arg0: i32) -> (i32, i32) {
    %c0_i32 = arith.constant 0 : i32
    %c0_i32_0 = arith.constant 0 : i32
    return %arg0, %c0_i32 : i32, i32
  }
}

</mosaic_0001>

<bundles_post_ra>
// kernel: tpu_custom_call.1
= control target key start
LH: loop header
LB: loop body
LE: loop exit
PB: predicated region body
PF: predicated region fallthrough
CT: control target
= control target key end

     0   :  { %12 = vsyncpa [#allocation3], 0  ;;  %s538_s0 = inlined_call_operand.hbm [shape: f32[8,16], index: 0, kind: input, shape index: {}]   ;;  %s539_s1 = inlined_call_operand.vmem [shape: f32[16,32], index: 1, kind: input, shape index: {}]   ;;  %s540_s2 = inlined_call_operand.vmem [shape: f32[1,32], index: 2, kind: input, shape index: {}]   ;;  %s541_s3 = inlined_call_operand.vmem [shape: f32[32,32], index: 3, kind: input, shape index: {}]   ;;  %s542_s4 = inlined_call_operand.vmem [shape: f32[1,32], index: 4, kind: input, shape index: {}]   ;;  %s543_s5 = inlined_call_operand.vmem [shape: f32[32,8], index: 5, kind: input, shape index: {}]   ;;  %s544_s6 = inlined_call_operand.vmem [shape: f32[1,8], index: 6, kind: input, shape index: {}]   ;;  %s545_s7 = inlined_call_operand.hbm [shape: f32[8,8], index: 7, kind: output, shape index: {}]  }
   0x1   :  { %13 = vsyncpa [#allocation4], 0  ;;  %s427_s24 = smov [#allocation2]   ;;  %s379_s28 = scalar_lea.hbm %s538_s0, 128 }
   0x2   :  { %s20_s25 = sshll.u32 %s427_s24, 4  ;;  %p380_p0 = scmp.ne.s32.totalorder %s538_s0, %s379_s28  ;;  %s21_s25 = int_to_ptr.vmem [resolvable:$true] %s20_s25 }
   0x3   :  { %p383_p1 = scmp.lt.u32.totalorder %s379_s28, %s538_s0 }
   0x5   :  { %p385_p2 = pnand %p383_p1, %p380_p0 }
   0x7   :  { %388 = shalt.err (!%p385_p2)
}
   0x8   :  { %s389_s10 = scalar_lea.vmem %s21_s25, 128  ;;  %p394_p4 = scmp.lt.s32.totalorder %s21_s25, %s21_s25 }
   0x9   :  { %p390_p3 = scmp.ne.s32.totalorder %s21_s25, %s389_s10  ;;  %p395_p5 = scmp.lt.s32.totalorder %s389_s10, %s389_s10 }
   0xb   :  { %p396_p6 = por %p395_p5, %p394_p4 }
   0xd   :  { %p397_p7 = pnand %p396_p6, %p390_p3 }
   0xf   :  { %400 = shalt.err (!%p397_p7)
}
  0x10   :  { %23 = dma.hbm_to_vmem [thread:$0]  %s538_s0, 128, %s21_s25, [#allocation3]  }
  0x11   :  { %423 = dma.done.wait [#allocation3], 128  }
  0x12   :  { %424 = vsyncadd [#allocation3], 4294967168  ;;  %v428_v0 = vmov 0.0|0.0   ;;  %vm429_vm0 = vmmov 0   ;;  %v430_v1 = vmov 0.0   ;;  %v40_v2 = vld [vmem:[%s539_s1] sm:$0xff] }
  0x13   :  { %359 = vmatprep.subr.bf16.mxu0 %v428_v0  ;;  %334 = vmatprep.mubr.msk.f32.mxu0 %vm429_vm0, %v430_v1  ;;  %v41_v3 = vld [vmem:[%s539_s1 + $0x8] sm:$0xff]  ;;  %v124_v5 = vld [vmem:[%s541_s3] sm:$0xff]  ;;  %vm49_vm1 = vcmask 130048   ;;  %v126_v9 = vld [vmem:[%s541_s3 + $0x10] sm:$0xff]  ;;  %vm135_vm2 = vcmask 261120   ;;  %s431_s12 = smov [#allocation5]  }
  0x14   :  { %362 = vmatprep.subr.bf16.mxu1 %v428_v0  ;;  %345 = vmatprep.mubr.msk.f32.mxu1 %vm429_vm0, %v430_v1  ;;  %v360_v4 = vpack.c.bf16 %v41_v3, %v40_v2  ;;  %v125_v6 = vld [vmem:[%s541_s3 + $0x8] sm:$0xff]  ;;  %v39_v8 = vld [vmem:[#allocation2] sm:$0xff]  ;;  %v127_v10 = vld [vmem:[%s541_s3 + $0x18] sm:$0xff]  ;;  %s302_s13 = sshll.u32 %s431_s12, 4  ;;  %vm294_vm3 = vcmask 64512   ;;  %s303_s13 = int_to_ptr.vmem [resolvable:$true] %s302_s13 }
  0x15   :  { %v363_v7 = vpack.c.bf16 %v125_v6, %v124_v5  ;;  %v366_v11 = vpack.c.bf16 %v127_v10, %v126_v9  ;;  %v210_v12 = vld [vmem:[%s543_s5] sm:$0xff]  ;;  %v211_v13 = vld [vmem:[%s543_s5 + $0x8] sm:$0xff]  ;;  %v212_v20 = vld [vmem:[%s543_s5 + $0x10] sm:$0xff]  ;;  %p406_p9 = scmp.lt.s32.totalorder %s303_s13, %s303_s13 }
  0x16   :  { %361 = vmatpush3.bf16.msra.mxu0 %v360_v4  ;;  %v369_v14 = vpack.c.bf16 %v211_v13, %v210_v12  ;;  %v311_v15 = vld [vmem:[%s540_s2] ss:$0 sm:$0xff]  ;;  %v213_v21 = vld [vmem:[%s543_s5 + $0x18] sm:$0xff]  ;;  %s401_s5 = scalar_lea.vmem %s303_s13, 128 }
  0x17   :  { %364 = vmatpush3.bf16.msra.mxu1 %v363_v7  ;;  %368 = vmatprep.subr.bf16.mxu0 %v428_v0  ;;  %v372_v22 = vpack.c.bf16 %v213_v21, %v212_v20  ;;  %v313_v23 = vld [vmem:[%s542_s4] ss:$0 sm:$0xff]  ;;  %p402_p8 = scmp.ne.s32.totalorder %s303_s13, %s401_s5  ;;  %p407_p10 = scmp.lt.s32.totalorder %s401_s5, %s401_s5 }
  0x18   :  { %365 = vmatprep.subr.bf16.mxu1 %v428_v0  ;;  %v315_v28 = vld [vmem:[%s544_s6] ss:$0 sm:$0xff] }
  0x19   :  { %335 = vmatmul.mubr.msk.f32.vlgmr.msra.gmra.mrb[0].mxu0 %vm49_vm1, %v39_v8  ;;  %p408_p11 = por %p407_p10, %p406_p9 }
  0x1a   :  { %356 = vmatprep.mubr.msk.f32.mxu0 %vm429_vm0, %v430_v1  ;;  %370 = vmatpush3.bf16.msra.mxu0 %v369_v14 }
  0x1b   :  { %367 = vmatpush3.bf16.msra.mxu1 %v366_v11  ;;  %371 = vmatprep.subr.bf16.mxu0 %v428_v0  ;;  %p409_p12 = pnand %p408_p11, %p402_p8 }
  0x1e   :  { %373 = vmatpush3.bf16.msra.mxu0 %v372_v22 }
  0xec   :  { %v119_v16 = vpop.f32.mrb[0].mxu0 }
  0xed   :  { %v120_v17 = vadd.f32 %v311_v15, %v119_v16  ;;  %v336_v18 = vpop.f32.mrb[1].mxu0 }
  0xef   :  { %v123_v19 = vmax.f32 %v120_v17, 0.0 }
  0xf1   :  { %346 = vmatmul.mubr.msk.f32.vlgmr.msra.gmra.mrb[0].mxu1 %vm135_vm2, %v123_v19 }
 0x1c4   :  { %v205_v24 = vpop.f32.mrb[0].mxu1 }
 0x1c5   :  { %v206_v25 = vadd.f32 %v313_v23, %v205_v24  ;;  %v347_v26 = vpop.f32.mrb[1].mxu1 }
 0x1c7   :  { %v209_v27 = vmax.f32 %v206_v25, 0.0 }
 0x1c9   :  { %357 = vmatmul.mubr.msk.f32.vlgmr.msra.gmra.mrb[2].mxu0 %vm135_vm2, %v209_v27 }
 0x29c   :  { %v290_v29 = vpop.f32.mrb[2].mxu0 }
 0x29d   :  { %v291_v30 = vadd.f32 %v315_v28, %v290_v29  ;;  %v358_v31 = vpop.f32.mrb[3].mxu0 }
 0x29f   :  { %295 = vst.msk [vmem:[#allocation5] sm:$0xff] %vm294_vm3, %v291_v30 }
 0x2a0   :  { %412 = shalt.err (!%p409_p12)
}
 0x2a1   :  { %s413_s15 = scalar_lea.hbm %s545_s7, 128 }
 0x2a2   :  { %p414_p13 = scmp.ne.s32.totalorder %s545_s7, %s413_s15  ;;  %p417_p0 = scmp.lt.u32.totalorder %s413_s15, %s545_s7 }
 0x2a4   :  { %p419_p1 = pnand %p417_p0, %p414_p13 }
 0x2a6   :  { %422 = shalt.err (!%p419_p1)
}
 0x2a7   :  { %305 = dma.vmem_to_hbm [thread:$0]  %s303_s13, 128, %s545_s7, [#allocation4]  }
 0x2a8   :  { %425 = dma.done.wait [#allocation4], 128  }
 0x2a9   :  { %426 = vsyncadd [#allocation4], 4294967168 }
 0x2aa   :  { %309 = vsyncpa [#allocation3], 1 }
 0x2ab   :  { %310 = vsyncpa [#allocation4], 1 }

</bundles_post_ra>
